<compile_context>
chip_gen: v7x
topology: tpu7x:2x2x1
jax: 0.10.0
libtpu: 0.0.40
codegen_flags: <defaults>
</compile_context>

<pallas_src>
import jax
import jax.numpy as jnp
from jax.experimental import pallas as pl
from jax.experimental.pallas import tpu as pltpu


def _chunk_starts_sizes(n_rows, n_chunks):
    """Split n_rows into up to n_chunks static, nearly-equal (start, size) pieces."""
    n_chunks = max(1, min(int(n_chunks), int(n_rows)))
    base, rem = divmod(int(n_rows), n_chunks)
    chunks, start = [], 0
    for i in range(n_chunks):
        size = base + (1 if i < rem else 0)
        if size > 0:
            chunks.append((start, size))
            start += size
    return tuple(chunks)


def _make_dma_copy_kernel(chunks):
    """Kernel factory: chunked HBM->HBM async copies over static row ranges."""
    single = len(chunks) == 1

    def kernel(x_hbm, o_hbm, sems):
        copies = []
        for idx, (start, size) in enumerate(chunks):
            src = x_hbm if single else x_hbm.at[pl.ds(start, size)]
            dst = o_hbm if single else o_hbm.at[pl.ds(start, size)]
            cp = pltpu.make_async_copy(src, dst, sems.at[idx])
            cp.start()
            copies.append(cp)
        for cp in copies:   # wait after all starts -> DMAs overlap
            cp.wait()

    return kernel


def noop_transformer_layer(hidden_states, attention_mask=None,
                           encoder_output=None, enc_dec_attn_mask=None,
                           inference_params=None, *,
                           max_dma_streams=4,
                           chunk_threshold_bytes=8 * 1024 * 1024):
    """Pallas equivalent of NoopTransformerLayer.forward (hidden_states.clone()).

    attention_mask / encoder_output / enc_dec_attn_mask / inference_params are
    accepted for signature parity but unused, exactly as in the PyTorch module.
    """
    dtype_bytes = jnp.dtype(hidden_states.dtype).itemsize
    total_bytes = int(hidden_states.size) * dtype_bytes

    # Split the leading axis into a few DMA streams for big tensors only.
    leading = hidden_states.shape[0] if hidden_states.ndim >= 1 else 1
    n_streams = max_dma_streams if total_bytes >= chunk_threshold_bytes else 1
    chunks = _chunk_starts_sizes(leading, n_streams)

    out = pl.pallas_call(
        _make_dma_copy_kernel(chunks),
        out_shape=jax.ShapeDtypeStruct(hidden_states.shape, hidden_states.dtype),
        in_specs=[pl.BlockSpec(memory_space=pl.ANY)],
        out_specs=pl.BlockSpec(memory_space=pl.ANY),
        scratch_shapes=[pltpu.SemaphoreType.DMA((len(chunks),))],
        cost_estimate=pl.CostEstimate(
            flops=0,
            transcendentals=0,
            bytes_accessed=2 * total_bytes,   # read + write once each
        ),
    )(hidden_states)
    return out


if __name__ == "__main__":
    key = jax.random.PRNGKey(0)
    k1, k2 = jax.random.split(key)

    # Megatron sequence-major layout: [seq, batch, hidden].  Small shapes.
    seq, batch, hidden = 8, 2, 128
    hidden_states = jax.random.normal(k1, (seq, batch, hidden), dtype=jnp.float32)
    attention_mask = jnp.ones((batch, 1, seq, seq), dtype=jnp.bool_)  # parity only

    out = noop_transformer_layer(hidden_states, attention_mask)
    jax.block_until_ready(out)
    assert out.shape == hidden_states.shape
    assert out.dtype == hidden_states.dtype
    assert bool(jnp.array_equal(out, hidden_states))

    # bf16 with a non-128-multiple hidden dim; also force the multi-DMA-stream
    # path (chunk_threshold_bytes=0) to exercise chunked copies at small size.
    hs2 = jax.random.normal(k2, (seq, batch, 96), dtype=jnp.float32).astype(jnp.bfloat16)
    out2 = noop_transformer_layer(hs2, attention_mask,
                                  max_dma_streams=4, chunk_threshold_bytes=0)
    jax.block_until_ready(out2)
    assert out2.shape == hs2.shape
    assert out2.dtype == hs2.dtype
    assert bool(jnp.array_equal(out2, hs2))

    print("KERNEL_OK")
</pallas_src>

<mosaic_0001>
module attributes {stable_mosaic.version = 11 : i64} {
  func.func @kernel(%arg0: memref<8x2x128xf32, #tpu.memory_space<any>>, %arg1: memref<8x2x128xf32, #tpu.memory_space<any>>, %arg2: memref<1x!tpu.dma_semaphore, #tpu.memory_space<semaphore_mem>>) attributes {dimension_semantics = [], scalar_prefetch = 0 : i64, scratch_operands = 1 : i64, tpu.core_type = #tpu.core_type<tc>} {
    %c0_i32 = arith.constant 0 : i32
    %0 = tpu.memref_slice %arg2[%c0_i32] : memref<1x!tpu.dma_semaphore, #tpu.memory_space<semaphore_mem>> -> memref<1x!tpu.dma_semaphore, #tpu.memory_space<semaphore_mem>>
    %1 = tpu.memref_squeeze %0 : memref<1x!tpu.dma_semaphore, #tpu.memory_space<semaphore_mem>> -> memref<!tpu.dma_semaphore, #tpu.memory_space<semaphore_mem>>
    tpu.enqueue_dma source(%arg0 : memref<8x2x128xf32, #tpu.memory_space<any>>) target(%arg1 : memref<8x2x128xf32, #tpu.memory_space<any>>) target_semaphore(%1 : memref<!tpu.dma_semaphore, #tpu.memory_space<semaphore_mem>>)
    %c0_i32_0 = arith.constant 0 : i32
    %2 = tpu.memref_slice %arg2[%c0_i32_0] : memref<1x!tpu.dma_semaphore, #tpu.memory_space<semaphore_mem>> -> memref<1x!tpu.dma_semaphore, #tpu.memory_space<semaphore_mem>>
    %3 = tpu.memref_squeeze %2 : memref<1x!tpu.dma_semaphore, #tpu.memory_space<semaphore_mem>> -> memref<!tpu.dma_semaphore, #tpu.memory_space<semaphore_mem>>
    tpu.wait_dma2 semaphore(%3 : memref<!tpu.dma_semaphore, #tpu.memory_space<semaphore_mem>>) src(%arg0 : memref<8x2x128xf32, #tpu.memory_space<any>>) dst(%arg1 : memref<8x2x128xf32, #tpu.memory_space<any>>)
    return
  }
}

</mosaic_0001>

<bundles_post_ra>
// kernel: tpu_custom_call.1
= control target key start
LH: loop header
LB: loop body
LE: loop exit
PB: predicated region body
PF: predicated region fallthrough
CT: control target
= control target key end

     0   :  { %s35_s6 = smov [#allocation2]   ;;  %s36_s7 = smov [#allocation3]   ;;  %s54_s0 = inlined_call_operand.hbm [shape: f32[8,2,128], index: 0, kind: input, shape index: {}]   ;;  %s55_s1 = inlined_call_operand.hbm [shape: f32[8,2,128], index: 1, kind: output, shape index: {}]  }
   0x1   :  { %s37_s8 = smov 0  }
   0x2   :  { %18 = dma.general %s54_s0, 256, %s55_s1, %s35_s6, %s36_s7, [#allocation4], %s37_s8, 0  }
   0x3   :  { %33 = dma.done.wait [#allocation2], 256 }
   0x4   :  { %34 = vsyncadd [#allocation2], 4294967040 }
   0x5   :  { %23 = vsyncmov [#allocation2] }
   0x8   :  { %s24_s13 = vpop.sfrf %23 }
   0x9   :  { %p29_p0 = scmp.ne.s32.totalorder %s24_s13, 0 }
   0xb   :  { %28 = shalt.err (%p29_p0)  }

</bundles_post_ra>
